<compile_context>
chip_gen: v5e
topology: v5e:2x2
jax: 0.10.0
libtpu: 0.0.40
codegen_flags: <defaults>
</compile_context>

<pallas_src>
import numpy as np
import jax
import jax.numpy as jnp
from jax.experimental import pallas as pl
from jax.experimental.pallas import tpu as pltpu

EPS = 1e-12
K1D = np.array([0.05, 0.25, 0.4, 0.25, 0.05], dtype=np.float32)


def _replicate_conv_matrix(n, taps):
    """M[i, j] = sum_a taps[a] * [clamp(i + a - r, 0, n-1) == j]  (replicate pad)."""
    r = len(taps) // 2
    m = np.zeros((n, n), dtype=np.float64)
    for i in range(n):
        for a, kv in enumerate(taps):
            j = min(max(i + a - r, 0), n - 1)
            m[i, j] += float(kv)
    return m


def _build_operators(h, w, tb):
    """Fold (conv -> even mask * 4 -> conv) into a left (h,h) and a
    block-diagonal right (tb*w, tb*w) operator: f2 = AL @ img @ BRbd."""
    A = _replicate_conv_matrix(h, K1D)          # (h, h) row operator
    Bm = _replicate_conv_matrix(w, K1D).T       # (w, w) column operator (transposed)
    Er = np.diag((np.arange(h) % 2 == 0).astype(np.float64))
    Ec = np.diag((np.arange(w) % 2 == 0).astype(np.float64))
    AL = 2.0 * (A @ Er @ A)                     # (h, h)
    BR = 2.0 * (Bm @ Ec @ Bm)                   # (w, w)
    BRbd = np.kron(np.eye(tb, dtype=np.float64), BR)   # (tb*w, tb*w), block diagonal
    return (jnp.asarray(AL, dtype=jnp.float32),
            jnp.asarray(BRbd, dtype=jnp.float32))


def _pick_tb(B, w, max_lanes=512):
    """Largest divisor TB of B with TB*w <= max_lanes (lane packing factor)."""
    tb = 1
    for d in range(1, B + 1):
        if B % d == 0 and d * w <= max_lanes:
            tb = d
    return tb


def _edge_loss_kernel(al_ref, br_ref, x_ref, y_ref, out_ref):
    # x_ref / y_ref blocks: (1, h, TB*w) lane-packed image tiles.
    d0 = x_ref[0] - y_ref[0]                                    # (h, L)
    t = jnp.dot(al_ref[...], d0, preferred_element_type=jnp.float32)
    f2 = jnp.dot(t, br_ref[...], preferred_element_type=jnp.float32)
    d = d0 - f2                                                 # laplacian(x - y)
    err = jnp.sqrt(d * d + EPS)                                 # Charbonnier
    out_ref[...] = jnp.broadcast_to(jnp.sum(err), out_ref.shape)


def edge_loss(x, y):
    """x, y: (n, t, c, h, w) with c == 1 (as required by the (1,1,5,5) conv weight)."""
    n, t, c, h, w = x.shape
    assert c == 1, "EdgeLoss conv weight has a single input channel"
    B = n * t * c

    TB = _pick_tb(B, w)
    num_tiles = B // TB
    lanes = TB * w

    xb = x.reshape(B, h, w).astype(jnp.float32)
    yb = y.reshape(B, h, w).astype(jnp.float32)
    # Lane-pack TB images per tile: (num_tiles, h, TB*w)  (layout plumbing only).
    xp = xb.reshape(num_tiles, TB, h, w).transpose(0, 2, 1, 3).reshape(num_tiles, h, lanes)
    yp = yb.reshape(num_tiles, TB, h, w).transpose(0, 2, 1, 3).reshape(num_tiles, h, lanes)

    AL, BRbd = _build_operators(h, w, TB)

    partials = pl.pallas_call(
        _edge_loss_kernel,
        out_shape=jax.ShapeDtypeStruct((num_tiles, 1, 1), jnp.float32),
        grid_spec=pltpu.PrefetchScalarGridSpec(
            num_scalar_prefetch=0,
            grid=(num_tiles,),
            in_specs=[
                pl.BlockSpec((h, h), lambda b: (0, 0)),            # AL (stays resident)
                pl.BlockSpec((lanes, lanes), lambda b: (0, 0)),    # block-diag BR
                pl.BlockSpec((1, h, lanes), lambda b: (b, 0, 0)),  # x tile
                pl.BlockSpec((1, h, lanes), lambda b: (b, 0, 0)),  # y tile
            ],
            out_specs=pl.BlockSpec((1, 1, 1), lambda b: (b, 0, 0)),
        ),
        compiler_params=pltpu.CompilerParams(
            dimension_semantics=("parallel",)),   # independent per-tile partial sums
    )(AL, BRbd, xp, yp)

    return jnp.sum(partials) / (B * h * w)


# ---------------- pure-JAX reference (for a correctness check) ----------------
def _conv_gauss_ref(img):  # img: (B, H, W)
    pad = jnp.pad(img, ((0, 0), (2, 2), (2, 2)), mode="edge")
    H, W = img.shape[1], img.shape[2]
    out = jnp.zeros_like(img)
    for a in range(5):
        for b in range(5):
            out = out + K1D[a] * K1D[b] * pad[:, a:a + H, b:b + W]
    return out


def _laplacian_ref(img):
    f = _conv_gauss_ref(img)
    H, W = img.shape[1], img.shape[2]
    mask = ((jnp.arange(H)[:, None] % 2) == 0) & ((jnp.arange(W)[None, :] % 2) == 0)
    nf = jnp.where(mask[None], 4.0 * f, 0.0)
    f2 = _conv_gauss_ref(nf)
    return img - f2


def _edge_loss_ref(x, y):
    n, t, c, h, w = x.shape
    xb = x.reshape(n * t * c, h, w).astype(jnp.float32)
    yb = y.reshape(n * t * c, h, w).astype(jnp.float32)
    d = _laplacian_ref(xb) - _laplacian_ref(yb)
    return jnp.mean(jnp.sqrt(d * d + EPS))


if __name__ == "__main__":
    key = jax.random.PRNGKey(0)
    kx, ky = jax.random.split(key)
    # n=2, t=4, c=1, h=16, w=16
    x = jax.random.normal(kx, (2, 4, 1, 16, 16), dtype=jnp.float32)
    y = jax.random.normal(ky, (2, 4, 1, 16, 16), dtype=jnp.float32)

    loss = edge_loss(x, y)
    jax.block_until_ready(loss)

    ref = _edge_loss_ref(x, y)
    assert jnp.allclose(loss, ref, rtol=1e-4, atol=1e-5), (loss, ref)

    print("KERNEL_OK")
</pallas_src>

<mosaic_0001>
module attributes {stable_mosaic.version = 11 : i64} {
  func.func @_edge_loss_kernel(%arg0: i32, %arg1: memref<16x16xf32, #tpu.memory_space<vmem>>, %arg2: memref<128x128xf32, #tpu.memory_space<vmem>>, %arg3: memref<1x16x128xf32, #tpu.memory_space<vmem>>, %arg4: memref<1x16x128xf32, #tpu.memory_space<vmem>>, %arg5: memref<1x1x1xf32, #tpu.memory_space<vmem>>) attributes {dimension_semantics = [#tpu.dimension_semantics<parallel>], iteration_bounds = array<i64: 1>, scalar_prefetch = 0 : i64, scratch_operands = 0 : i64, tpu.core_type = #tpu.core_type<tc>, window_params = [{pipeline_mode = #tpu.pipeline_mode<synchronous>, transform_indices = @transform_0, window_bounds = array<i64: 16, 16>}, {pipeline_mode = #tpu.pipeline_mode<synchronous>, transform_indices = @transform_1, window_bounds = array<i64: 128, 128>}, {transform_indices = @transform_2, window_bounds = array<i64: 1, 16, 128>}, {transform_indices = @transform_3, window_bounds = array<i64: 1, 16, 128>}, {transform_indices = @transform_4, window_bounds = array<i64: 1, 1, 1>}]} {
    %c0 = arith.constant 0 : index
    %c0_0 = arith.constant 0 : index
    %c0_1 = arith.constant 0 : index
    %0 = vector.load %arg3[%c0, %c0_0, %c0_1] : memref<1x16x128xf32, #tpu.memory_space<vmem>>, vector<1x16x128xf32>
    %1 = vector.shape_cast %0 : vector<1x16x128xf32> to vector<16x128xf32>
    %c0_2 = arith.constant 0 : index
    %c0_3 = arith.constant 0 : index
    %c0_4 = arith.constant 0 : index
    %2 = vector.load %arg4[%c0_2, %c0_3, %c0_4] : memref<1x16x128xf32, #tpu.memory_space<vmem>>, vector<1x16x128xf32>
    %3 = vector.shape_cast %2 : vector<1x16x128xf32> to vector<16x128xf32>
    %4 = arith.subf %1, %3 : vector<16x128xf32>
    %c0_5 = arith.constant 0 : index
    %c0_6 = arith.constant 0 : index
    %5 = vector.load %arg1[%c0_5, %c0_6] : memref<16x16xf32, #tpu.memory_space<vmem>>, vector<16x16xf32>
    %cst = arith.constant dense<0.000000e+00> : vector<16x128xf32>
    %6 = tpu.matmul %5, %4, %cst {dimension_numbers = #tpu.dot_dimension_numbers<[1], [0], [0], [1], [0, 0, 1, 1], [], []>} : vector<16x16xf32>, vector<16x128xf32>, vector<16x128xf32> -> vector<16x128xf32>
    %c0_7 = arith.constant 0 : index
    %c0_8 = arith.constant 0 : index
    %7 = vector.load %arg2[%c0_7, %c0_8] : memref<128x128xf32, #tpu.memory_space<vmem>>, vector<128x128xf32>
    %cst_9 = arith.constant dense<0.000000e+00> : vector<16x128xf32>
    %8 = tpu.matmul %6, %7, %cst_9 {dimension_numbers = #tpu.dot_dimension_numbers<[1], [0], [0], [1], [0, 0, 1, 1], [], []>} : vector<16x128xf32>, vector<128x128xf32>, vector<16x128xf32> -> vector<16x128xf32>
    %9 = arith.subf %4, %8 : vector<16x128xf32>
    %10 = arith.mulf %9, %9 : vector<16x128xf32>
    %cst_10 = arith.constant 9.99999996E-13 : f32
    %11 = vector.broadcast %cst_10 : f32 to vector<16x128xf32>
    %12 = arith.addf %10, %11 : vector<16x128xf32>
    %13 = math.sqrt %12 : vector<16x128xf32>
    %14 = vector.shape_cast %13 : vector<16x128xf32> to vector<1x16x128xf32>
    %cst_11 = arith.constant dense<0.000000e+00> : vector<1xf32>
    %15 = vector.multi_reduction <add>, %14, %cst_11 [1, 2] : vector<1x16x128xf32> to vector<1xf32>
    %16 = vector.shape_cast %15 : vector<1xf32> to vector<1x1x1xf32>
    %17 = vector.extract %16[0, 0, 0] : f32 from vector<1x1x1xf32>
    %18 = vector.broadcast %17 : f32 to vector<1x1x1xf32>
    %c0_12 = arith.constant 0 : index
    %c0_13 = arith.constant 0 : index
    %c0_14 = arith.constant 0 : index
    %19 = vector.load %arg5[%c0_12, %c0_13, %c0_14] : memref<1x1x1xf32, #tpu.memory_space<vmem>>, vector<1x1x1xf32>
    tpu.vector_store %arg5[%c0_12, %c0_13, %c0_14], %18 {strides = array<i32>} : memref<1x1x1xf32, #tpu.memory_space<vmem>>, vector<1x1x1xf32>,
    return
  }
  func.func @transform_0(%arg0: i32) -> (i32, i32) {
    %c0_i32 = arith.constant 0 : i32
    %c0_i32_0 = arith.constant 0 : i32
    %c0_i32_1 = arith.constant 0 : i32
    return %c0_i32, %c0_i32_0 : i32, i32
  }
  func.func @transform_1(%arg0: i32) -> (i32, i32) {
    %c0_i32 = arith.constant 0 : i32
    %c0_i32_0 = arith.constant 0 : i32
    %c0_i32_1 = arith.constant 0 : i32
    return %c0_i32, %c0_i32_0 : i32, i32
  }
  func.func @transform_2(%arg0: i32) -> (i32, i32, i32) {
    %c0_i32 = arith.constant 0 : i32
    %c0_i32_0 = arith.constant 0 : i32
    %c0_i32_1 = arith.constant 0 : i32
    return %arg0, %c0_i32, %c0_i32_0 : i32, i32, i32
  }
  func.func @transform_3(%arg0: i32) -> (i32, i32, i32) {
    %c0_i32 = arith.constant 0 : i32
    %c0_i32_0 = arith.constant 0 : i32
    %c0_i32_1 = arith.constant 0 : i32
    return %arg0, %c0_i32, %c0_i32_0 : i32, i32, i32
  }
  func.func @transform_4(%arg0: i32) -> (i32, i32, i32) {
    %c0_i32 = arith.constant 0 : i32
    %c0_i32_0 = arith.constant 0 : i32
    %c0_i32_1 = arith.constant 0 : i32
    return %arg0, %c0_i32, %c0_i32_0 : i32, i32, i32
  }
}

</mosaic_0001>

<bundles_post_ra>
// kernel: tpu_custom_call.1
= control target key start
LH: loop header
LB: loop body
LE: loop exit
PB: predicated region body
PF: predicated region fallthrough
CT: control target
= control target key end

     0   :  { %9 = vsyncpa [#allocation3], 0  ;;  %s432_s0 = inlined_call_operand.hbm [shape: f32[16,16], index: 0, kind: input, shape index: {}]   ;;  %s433_s1 = inlined_call_operand.hbm [shape: f32[128,128], index: 1, kind: input, shape index: {}]   ;;  %s434_s2 = inlined_call_operand.hbm [shape: f32[1,16,128], index: 2, kind: input, shape index: {}]   ;;  %s435_s3 = inlined_call_operand.hbm [shape: f32[1,16,128], index: 3, kind: input, shape index: {}]   ;;  %s436_s4 = inlined_call_operand.hbm [shape: f32[1,1,1], index: 4, kind: output, shape index: {}]  }
   0x1   :  { %10 = vsyncpa [#allocation6], 0 }
   0x2   :  { %11 = vsyncpa [#allocation9], 0 }
   0x3   :  { %12 = vsyncpa [#allocation4], 0  ;;  %s30_s17 = sshll.u32 %s433_s1, 4  ;;  %s379_s18 = smov [#allocation5]   ;;  %s31_s17 = int_to_ptr.hbm [resolvable:$true] %s30_s17 }
   0x4   :  { %s32_s19 = sshll.u32 %s379_s18, 4  ;;  %s17_s22 = sshll.u32 %s432_s0, 4  ;;  %s33_s19 = int_to_ptr.vmem [resolvable:$true] %s32_s19  ;;  %s18_s22 = int_to_ptr.hbm [resolvable:$true] %s17_s22 }
   0x5   :  { %s380_s23 = smov 128   ;;  %s381_s24 = smov 8  }
   0x6   :  { %38 = dma.hbm_to_vmem [thread:$0]  %s31_s17, 2048, %s33_s19, [#allocation6], %s380_s23, %s380_s23, %s381_s24  }
   0x7   :  { %s382_s25 = smov [#allocation2]   ;;  %s43_s29 = sshll.u32 %s434_s2, 4  ;;  %s44_s29 = int_to_ptr.hbm [resolvable:$true] %s43_s29 }
   0x8   :  { %s19_s26 = sshll.u32 %s382_s25, 4  ;;  %s56_s5 = sshll.u32 %s435_s3, 4  ;;  %s20_s26 = int_to_ptr.vmem [resolvable:$true] %s19_s26  ;;  %s57_s5 = int_to_ptr.hbm [resolvable:$true] %s56_s5 }
   0x9   :  { %25 = dma.hbm_to_vmem [thread:$0]  %s18_s22, 256, %s20_s26, [#allocation3], %s380_s23, %s380_s23, %s381_s24  }
   0xa   :  { %s383_s6 = smov [#allocation7]   ;;  %s384_s0 = smov [#allocation8]  }
   0xb   :  { %s45_s7 = sshll.u32 %s383_s6, 4  ;;  %s58_s8 = sshll.u32 %s384_s0, 4  ;;  %s46_s7 = int_to_ptr.vmem [resolvable:$true] %s45_s7  ;;  %s59_s8 = int_to_ptr.vmem [resolvable:$true] %s58_s8 }
   0xc   :  { %51 = dma.hbm_to_vmem [thread:$0]  %s44_s29, 256, %s46_s7, [#allocation6], %s380_s23, %s380_s23, %s381_s24  }
   0xd   :  { %64 = dma.hbm_to_vmem [thread:$0]  %s57_s5, 256, %s59_s8, [#allocation9], %s380_s23, %s380_s23, %s381_s24  }
   0xe   :  { %371 = dma.done.wait [#allocation3], 256  }
   0xf   :  { %372 = vsyncadd [#allocation3], 4294967040 }
  0x10   :  { %373 = dma.done.wait [#allocation6], 2304  }
  0x11   :  { %374 = vsyncadd [#allocation6], 4294964992 }
  0x12   :  { %375 = dma.done.wait [#allocation9], 256  }
  0x13   :  { %376 = vsyncadd [#allocation9], 4294967040  ;;  %v82_v0 = vld [vmem:[#allocation7 + $0x8] sm:$0xff]  ;;  %v84_v1 = vld [vmem:[#allocation8 + $0x8] sm:$0xff]  ;;  %vm89_vm0 = vcmask 130048   ;;  %s385_s2 = smov [#allocation10]  }
  0x14   :  { %v81_v2 = vld [vmem:[#allocation7] sm:$0xff]  ;;  %v423_v3 = vsub.f32 %v82_v0, %v84_v1  ;;  %v83_v4 = vld [vmem:[#allocation8] sm:$0xff]  ;;  %v134_v6 = vld [vmem:[#allocation5 + $0x78] sm:$0xff]  ;;  %s206_s3 = sshll.u32 %s385_s2, 4  ;;  %s208_s11 = sshll.u32 %s436_s4, 4  ;;  %vm199_vm5 = vcmask 0   ;;  %s207_s3 = int_to_ptr.vmem [resolvable:$true] %s206_s3  ;;  %s209_s11 = int_to_ptr.hbm [resolvable:$true] %s208_s11 }
  0x15   :  { %v85_v5 = vsub.f32 %v81_v2, %v83_v4  ;;  %v133_v7 = vld [vmem:[#allocation5 + $0x70] sm:$0xff]  ;;  %135 = vmatpush.msra.mxu1 %v134_v6  ;;  %v132_v9 = vld [vmem:[#allocation5 + $0x68] sm:$0xff]  ;;  %222 = vmatpush.msra.mxu2 %v134_v6  ;;  %v131_v10 = vld [vmem:[#allocation5 + $0x60] sm:$0xff] }
  0x16   :  { %110 = vmatpush.msra.mxu0 %v423_v3  ;;  %v87_v8 = vld [vmem:[#allocation2] sm:$0xff]  ;;  %v130_v11 = vld [vmem:[#allocation5 + $0x58] sm:$0xff]  ;;  %v128_v14 = vld [vmem:[#allocation5 + $0x48] sm:$0xff] }
  0x17   :  { %136 = vmatpush.msra.mxu1 %v133_v7  ;;  %223 = vmatpush.msra.mxu2 %v133_v7  ;;  %v129_v12 = vld [vmem:[#allocation5 + $0x50] sm:$0xff]  ;;  %v88_v13 = vld [vmem:[#allocation2 + $0x8] sm:$0xff]  ;;  %v127_v15 = vld [vmem:[#allocation5 + $0x40] sm:$0xff] }
  0x18   :  { %111 = vmatpush.msra.mxu0 %v85_v5  ;;  %v126_v16 = vld [vmem:[#allocation5 + $0x38] sm:$0xff]  ;;  %v125_v17 = vld [vmem:[#allocation5 + $0x30] sm:$0xff]  ;;  %v124_v18 = vld [vmem:[#allocation5 + $0x28] sm:$0xff] }
  0x19   :  { %220 = vmatmul.msk.f32.vlgmr.msra.gmra.mxu0 %vm89_vm0, %v87_v8  ;;  %137 = vmatpush.msra.mxu1 %v132_v9  ;;  %v123_v19 = vld [vmem:[#allocation5 + $0x20] sm:$0xff]  ;;  %v122_v20 = vld [vmem:[#allocation5 + $0x18] sm:$0xff]  ;;  %v121_v21 = vld [vmem:[#allocation5 + $0x10] sm:$0xff] }
  0x1a   :  { %224 = vmatpush.msra.mxu2 %v132_v9  ;;  %v120_v22 = vld [vmem:[#allocation5 + $0x8] sm:$0xff]  ;;  %v119_v23 = vld [vmem:[#allocation5] sm:$0xff] }
  0x1b   :  { %138 = vmatpush.msra.mxu1 %v131_v10 }
  0x1c   :  { %225 = vmatpush.msra.mxu2 %v131_v10 }
  0x1d   :  { %139 = vmatpush.msra.mxu1 %v130_v11 }
  0x1e   :  { %226 = vmatpush.msra.mxu2 %v130_v11 }
  0x1f   :  { %140 = vmatpush.msra.mxu1 %v129_v12 }
  0x20   :  { %227 = vmatpush.msra.mxu2 %v129_v12 }
  0x21   :  { %221 = vmatmul.msk.f32.gmra.mxu0 %vm89_vm0, %v88_v13  ;;  %141 = vmatpush.msra.mxu1 %v128_v14 }
  0x22   :  { %228 = vmatpush.msra.mxu2 %v128_v14 }
  0x23   :  { %142 = vmatpush.msra.mxu1 %v127_v15 }
  0x24   :  { %229 = vmatpush.msra.mxu2 %v127_v15 }
  0x25   :  { %143 = vmatpush.msra.mxu1 %v126_v16 }
  0x26   :  { %230 = vmatpush.msra.mxu2 %v126_v16 }
  0x27   :  { %144 = vmatpush.msra.mxu1 %v125_v17 }
  0x28   :  { %231 = vmatpush.msra.mxu2 %v125_v17 }
  0x29   :  { %145 = vmatpush.msra.mxu1 %v124_v18 }
  0x2a   :  { %232 = vmatpush.msra.mxu2 %v124_v18 }
  0x2b   :  { %146 = vmatpush.msra.mxu1 %v123_v19 }
  0x2c   :  { %233 = vmatpush.msra.mxu2 %v123_v19 }
  0x2d   :  { %147 = vmatpush.msra.mxu1 %v122_v20 }
  0x2e   :  { %234 = vmatpush.msra.mxu2 %v122_v20 }
  0x2f   :  { %148 = vmatpush.msra.mxu1 %v121_v21 }
  0x30   :  { %235 = vmatpush.msra.mxu2 %v121_v21 }
  0x31   :  { %149 = vmatpush.msra.mxu1 %v120_v22 }
  0x32   :  { %236 = vmatpush.msra.mxu2 %v120_v22 }
  0x33   :  { %150 = vmatpush.msra.mxu1 %v119_v23 }
  0x34   :  { %237 = vmatpush.msra.mxu2 %v119_v23 }
  0x96   :  { %v113_v24 = vpop.f32.mrf.mxu0 }
  0x97   :  { %151 = vmatmul.f32.vlgmr.msra.gmra.mxu1 %v113_v24 }
  0x9e   :  { %v116_v25 = vpop.f32.mrf.mxu0 }
  0x9f   :  { %154 = vmatmul.f32.vlgmr.msra.gmra.mxu2 %v116_v25 }
 0x114   :  { %v152_v26 = vpop.f32.mrf.mxu1 }
 0x115   :  { %v158_v27 = vsub.f32 %v85_v5, %v152_v26 }
 0x117   :  { %v160_v28 = vmul.f32 %v158_v27, %v158_v27 }
 0x119   :  { %v162_v29 = vadd.f32 1e-12, %v160_v28 }
 0x11b   :  { %247 = vrsqrt.f32 %v162_v29  ;;  %vm171_vm1 = vcmp.eq.f32.partialorder %v162_v29, inf  ;;  %v174_v49 = vand.u32 2147483648, %v162_v29  ;;  %vm173_vm3 = vcmp.eq.f32.partialorder %v162_v29, 0.0 }
 0x121   :  { %v248_v30 = vpop.eup %247 }
 0x122   :  { %v155_v31 = vpop.f32.mrf.mxu2  ;;  %v165_v32 = vmul.f32 %v248_v30, %v162_v29 }
 0x123   :  { %v159_v33 = vsub.f32 %v423_v3, %v155_v31 }
 0x124   :  { %v166_v35 = vmul.f32 %v248_v30, %v165_v32 }
 0x125   :  { %v161_v34 = vmul.f32 %v159_v33, %v159_v33 }
 0x126   :  { %v167_v37 = vmul.f32 0.5, %v166_v35 }
 0x127   :  { %v163_v36 = vadd.f32 1e-12, %v161_v34 }
 0x128   :  { %v168_v38 = vsub.f32 1.5, %v167_v37 }
 0x129   :  { %249 = vrsqrt.f32 %v163_v36  ;;  %vm183_vm2 = vcmp.eq.f32.partialorder %v163_v36, inf  ;;  %v186_v50 = vand.u32 2147483648, %v163_v36  ;;  %vm185_vm4 = vcmp.eq.f32.partialorder %v163_v36, 0.0 }
 0x12a   :  { %v169_v41 = vmul.f32 %v248_v30, %v168_v38 }
 0x12c   :  { %v170_v44 = vmul.f32 %v169_v41, %v162_v29 }
 0x12e   :  { %v172_v47 = vsel %vm171_vm1, %v162_v29, %v170_v44 }
 0x12f   :  { %v250_v39 = vpop.eup %249  ;;  %v175_v52 = vsel %vm173_vm3, %v174_v49, %v172_v47 }
 0x130   :  { %v177_v40 = vmul.f32 %v250_v39, %v163_v36 }
 0x132   :  { %v178_v42 = vmul.f32 %v250_v39, %v177_v40 }
 0x134   :  { %v179_v43 = vmul.f32 0.5, %v178_v42 }
 0x136   :  { %v180_v45 = vsub.f32 1.5, %v179_v43 }
 0x138   :  { %v181_v46 = vmul.f32 %v250_v39, %v180_v45 }
 0x13a   :  { %v182_v48 = vmul.f32 %v181_v46, %v163_v36 }
 0x13c   :  { %v184_v51 = vsel %vm183_vm2, %v163_v36, %v182_v48 }
 0x13d   :  { %v187_v53 = vsel %vm185_vm4, %v186_v50, %v184_v51 }
 0x13e   :  { %v188_v54 = vadd.f32 %v187_v53, %v175_v52 }
 0x140   :  { %189 = vadd.xlane.f32.xlu0 %v188_v54 }
 0x1b3   :  { %v190_v55 = vpop.xlane.xlu0 %189 }
 0x1b4   :  { %v191_v56 = vrot.slane %v190_v55, 4 }
 0x1b6   :  { %v192_v57 = vadd.f32 %v191_v56, %v190_v55 }
 0x1b8   :  { %v193_v58 = vrot.slane %v192_v57, 2 }
 0x1ba   :  { %v194_v59 = vadd.f32 %v193_v58, %v192_v57 }
 0x1bc   :  { %v195_v60 = vrot.slane %v194_v59, 1 }
 0x1be   :  { %v196_v61 = vadd.f32 %v195_v60, %v194_v59 }
 0x1c0   :  { %238 = vpush %v196_v61 }
 0x1f1   :  { %s239_s12 = spop %238 }
 0x1f2   :  { %v198_v62 = vstv %s239_s12 }
 0x1f3   :  { %200 = vst.msk [vmem:[#allocation10] sm:$0x1] %vm199_vm5, %v198_v62 }
 0x1f4   :  { %211 = dma.vmem_to_hbm [thread:$0]  %s207_s3, 16, %s209_s11, [#allocation4]  }
 0x1f5   :  { %377 = dma.done.wait [#allocation4], 16  }
 0x1f6   :  { %378 = vsyncadd [#allocation4], 4294967280 }
 0x1f7   :  { %216 = vsyncpa [#allocation3], 1 }
 0x1f8   :  { %217 = vsyncpa [#allocation6], 1 }
 0x1f9   :  { %218 = vsyncpa [#allocation9], 1 }
 0x1fa   :  { %219 = vsyncpa [#allocation4], 1 }

</bundles_post_ra>
